<compile_context>
chip_gen: v7x
topology: tpu7x:2x2x1
jax: 0.10.0
libtpu: 0.0.40
codegen_flags: <defaults>
</compile_context>

<pallas_src>
import functools

import jax
import jax.numpy as jnp
from jax import lax
from jax.experimental import pallas as pl
from jax.experimental.pallas import tpu as pltpu


def _shift_flat(y, s):
    """z[:, n] = y[:, n + s] if 0 <= n + s < N else 0 (s is a static int)."""
    if s == 0:
        return y
    C, N = y.shape
    z = jnp.zeros((C, abs(s)), y.dtype)
    if s > 0:
        return jnp.concatenate([y[:, s:], z], axis=1)
    return jnp.concatenate([z, y[:, : N + s]], axis=1)


def _bottleneck_kernel(x_ref, col_ref, win_ref, w1_ref, b1_ref, w2_ref, b2_ref,
                       wout_ref, o_ref, *, K, D, H, W, residual, mxu_dtype):
    """One batch image; activations stay as (C, H*W) (lane-dense) f32."""
    p = (K // 2) * D
    x = x_ref[0]                                     # (Cin, HW) f32
    w_idx = col_ref[...]                             # (1, HW) int32: n % W

    # ---- conv_in: 1x1, no bias, + relu -------------------------------------
    y = jnp.dot(win_ref[...], x.astype(mxu_dtype),
                preferred_element_type=jnp.float32)
    y = jnp.maximum(y, 0.0)                          # (Cmid, HW) f32

    # ---- conv_1xk: conv along W (dilation D, zero pad p), bias, relu -------
    # Tap j reads column offset o = j*D - p within the same image row: a lane
    # shift of the flattened array, with positions whose source column falls
    # outside [0, W) masked to zero (mask comes from the precomputed col ids).
    taps = []
    for j in range(K):                               # static unroll, K small
        o = j * D - p
        t = _shift_flat(y, o)
        if o > 0:
            t = jnp.where(w_idx < W - o, t, jnp.zeros_like(t))
        elif o < 0:
            t = jnp.where(w_idx >= -o, t, jnp.zeros_like(t))
        taps.append(t)
    taps = jnp.concatenate(taps, axis=0)             # (K*Cmid, HW) f32 (tile-aligned)
    y = jnp.dot(w1_ref[...], taps.astype(mxu_dtype),  # fused K-tap matmul
                preferred_element_type=jnp.float32)
    y = jnp.maximum(y + b1_ref[...], 0.0)            # (Cmid, HW) f32

    # ---- conv_kx1: conv along H (dilation D, zero pad p), bias, relu -------
    # A row offset o is a lane shift by o*W; out-of-image rows land exactly in
    # the zero fill of the shift, so no extra mask is needed.
    taps = []
    for j in range(K):
        o = j * D - p
        taps.append(_shift_flat(y, o * W))
    taps = jnp.concatenate(taps, axis=0)             # (K*Cmid, HW)
    y = jnp.dot(w2_ref[...], taps.astype(mxu_dtype),
                preferred_element_type=jnp.float32)
    y = jnp.maximum(y + b2_ref[...], 0.0)            # (Cmid, HW) f32

    # ---- conv_out: 1x1, no bias; residual add; final relu ------------------
    out = jnp.dot(wout_ref[...], y.astype(mxu_dtype),
                  preferred_element_type=jnp.float32)
    if residual:
        out = out + x                                # requires Cin == Cout
    o_ref[0] = jnp.maximum(out, 0.0)                 # (Cout, HW), dense lanes


def pack_params(torch_params, mxu_dtype=jnp.bfloat16):
    """Re-pack PyTorch OIHW conv weights into fused matmul layout.

    MXU operands get `mxu_dtype` (bf16 for v6e/v7x speed, f32 for exactness);
    biases stay f32 (elementwise math is always f32).
    """
    c = torch_params["conv_1xk_w"].shape[0]
    k = torch_params["conv_1xk_w"].shape[-1]
    # fused[(o, j*c + i)] = weight[o, i, ..., tap j]
    w1 = jnp.transpose(torch_params["conv_1xk_w"][:, :, 0, :], (0, 2, 1)).reshape(c, k * c)
    w2 = jnp.transpose(torch_params["conv_kx1_w"][:, :, :, 0], (0, 2, 1)).reshape(c, k * c)
    return {
        "w_in":  torch_params["conv_in_w"][:, :, 0, 0].astype(mxu_dtype),    # (c, c_in)
        "w_1xk": w1.astype(mxu_dtype),                                       # (c, k*c)
        "b_1xk": torch_params["conv_1xk_b"].reshape(c, 1).astype(jnp.float32),
        "w_kx1": w2.astype(mxu_dtype),                                       # (c, k*c)
        "b_kx1": torch_params["conv_kx1_b"].reshape(c, 1).astype(jnp.float32),
        "w_out": torch_params["conv_out_w"][:, :, 0, 0].astype(mxu_dtype),   # (c_out, c)
    }


def bottleneck_ddr2d(x_nchw, params, *, kernel=3, dilation=1, residual=True,
                     mxu_dtype=jnp.bfloat16):
    """x_nchw: (B, c_in, H, W) float32 (PyTorch layout). Returns (B, c_out, H, W)."""
    B, Cin, H, W = x_nchw.shape
    Cmid = params["w_in"].shape[0]
    Cout = params["w_out"].shape[0]
    K, D = kernel, dilation
    p = (K // 2) * D
    assert K % 2 == 1, "only odd kernel sizes reproduce Conv2d 'same' padding here"
    assert p < W and p < H, "padding must be smaller than the spatial extent"
    if residual:
        assert Cin == Cout, "residual path requires c_in == c_out"

    HW = H * W
    x_flat = x_nchw.reshape(B, Cin, HW).astype(jnp.float32)   # free reshape (NCHW)
    col_ids = (jnp.arange(HW, dtype=jnp.int32) % W).reshape(1, HW)

    body = functools.partial(_bottleneck_kernel, K=K, D=D, H=H, W=W,
                             residual=residual, mxu_dtype=mxu_dtype)

    # Advisory cost estimate for XLA's surrounding scheduler: matmul flops plus
    # one HBM read of x and one write of the output (weights are negligible).
    itemsize = jnp.dtype(mxu_dtype).itemsize
    flops = 2 * B * HW * (Cmid * Cin + 2 * K * Cmid * Cmid + Cmid * Cout)
    bytes_accessed = (B * Cin * HW * 4 + B * Cout * HW * 4 + HW * 4
                      + (Cmid * Cin + 2 * K * Cmid * Cmid + Cout * Cmid) * itemsize
                      + 2 * Cmid * 4)
    cost = pl.CostEstimate(flops=flops, transcendentals=0,
                           bytes_accessed=bytes_accessed)

    out = pl.pallas_call(
        body,
        out_shape=jax.ShapeDtypeStruct((B, Cout, HW), jnp.float32),
        grid_spec=pltpu.PrefetchScalarGridSpec(
            num_scalar_prefetch=0,
            grid=(B,),
            in_specs=[
                pl.BlockSpec((1, Cin, HW), lambda b: (b, 0, 0)),     # x
                pl.BlockSpec((1, HW), lambda b: (0, 0)),             # col ids
                pl.BlockSpec((Cmid, Cin), lambda b: (0, 0)),         # w_in
                pl.BlockSpec((Cmid, K * Cmid), lambda b: (0, 0)),    # w_1xk fused
                pl.BlockSpec((Cmid, 1), lambda b: (0, 0)),           # b_1xk
                pl.BlockSpec((Cmid, K * Cmid), lambda b: (0, 0)),    # w_kx1 fused
                pl.BlockSpec((Cmid, 1), lambda b: (0, 0)),           # b_kx1
                pl.BlockSpec((Cout, Cmid), lambda b: (0, 0)),        # w_out
            ],
            out_specs=pl.BlockSpec((1, Cout, HW), lambda b: (b, 0, 0)),
        ),
        compiler_params=pltpu.CompilerParams(dimension_semantics=("parallel",)),
        cost_estimate=cost,
    )(x_flat, col_ids, params["w_in"], params["w_1xk"], params["b_1xk"],
      params["w_kx1"], params["b_kx1"], params["w_out"])

    return out.reshape(B, Cout, H, W)


def _reference_nchw(x, tp, *, kernel, dilation, residual):
    """Pure-JAX reference with PyTorch-shaped (OIHW) weights and NCHW input."""
    p = (kernel // 2) * dilation
    dn = ("NCHW", "OIHW", "NCHW")
    y = lax.conv_general_dilated(x, tp["conv_in_w"], (1, 1), ((0, 0), (0, 0)),
                                 dimension_numbers=dn)
    y = jnp.maximum(y, 0.0)
    y = lax.conv_general_dilated(y, tp["conv_1xk_w"], (1, 1), ((0, 0), (p, p)),
                                 rhs_dilation=(1, dilation), dimension_numbers=dn)
    y = jnp.maximum(y + tp["conv_1xk_b"][None, :, None, None], 0.0)
    y = lax.conv_general_dilated(y, tp["conv_kx1_w"], (1, 1), ((p, p), (0, 0)),
                                 rhs_dilation=(dilation, 1), dimension_numbers=dn)
    y = jnp.maximum(y + tp["conv_kx1_b"][None, :, None, None], 0.0)
    y = lax.conv_general_dilated(y, tp["conv_out_w"], (1, 1), ((0, 0), (0, 0)),
                                 dimension_numbers=dn)
    return jnp.maximum(y + x, 0.0) if residual else jnp.maximum(y, 0.0)


if __name__ == "__main__":
    # Small shapes consistent with the module; residual requires c_in == c_out.
    B, H, W = 2, 16, 16
    c_in, c, c_out = 16, 8, 16
    kernel, residual = 3, True

    key = jax.random.PRNGKey(0)
    ks = jax.random.split(key, 7)

    # Deterministic parameters in PyTorch Conv2d layout (OIHW).
    torch_params = {
        "conv_in_w":  0.1 * jax.random.normal(ks[0], (c, c_in, 1, 1), jnp.float32),
        "conv_1xk_w": 0.1 * jax.random.normal(ks[1], (c, c, 1, kernel), jnp.float32),
        "conv_1xk_b": 0.1 * jax.random.normal(ks[2], (c,), jnp.float32),
        "conv_kx1_w": 0.1 * jax.random.normal(ks[3], (c, c, kernel, 1), jnp.float32),
        "conv_kx1_b": 0.1 * jax.random.normal(ks[4], (c,), jnp.float32),
        "conv_out_w": 0.1 * jax.random.normal(ks[5], (c_out, c, 1, 1), jnp.float32),
    }

    # Input in NCHW, exactly like the PyTorch module.
    x = jax.random.normal(ks[6], (B, c_in, H, W), jnp.float32)

    for dilation in (1, 2):
        ref = _reference_nchw(x, torch_params, kernel=kernel, dilation=dilation,
                              residual=residual)

        # Structural correctness check with f32 MXU operands (tight tolerance).
        p32 = pack_params(torch_params, mxu_dtype=jnp.float32)
        out32 = jax.block_until_ready(
            bottleneck_ddr2d(x, p32, kernel=kernel, dilation=dilation,
                             residual=residual, mxu_dtype=jnp.float32))
        assert out32.shape == (B, c_out, H, W)
        assert jnp.allclose(out32, ref, rtol=1e-3, atol=1e-3), \
            f"f32 mismatch vs reference (dilation={dilation})"

        # Fast path: bf16 MXU operands, f32 accumulation / elementwise.
        pbf = pack_params(torch_params, mxu_dtype=jnp.bfloat16)
        outbf = jax.block_until_ready(
            bottleneck_ddr2d(x, pbf, kernel=kernel, dilation=dilation,
                             residual=residual, mxu_dtype=jnp.bfloat16))
        assert outbf.shape == (B, c_out, H, W)
        assert jnp.allclose(outbf, ref, rtol=5e-2, atol=5e-2), \
            f"bf16 mismatch vs reference (dilation={dilation})"

    print("KERNEL_OK")
</pallas_src>

<mosaic_0001>
module attributes {stable_mosaic.version = 11 : i64} {
  func.func @_bottleneck_kernel(%arg0: i32, %arg1: memref<1x16x256xf32, #tpu.memory_space<vmem>>, %arg2: memref<1x256xi32, #tpu.memory_space<vmem>>, %arg3: memref<8x16xf32, #tpu.memory_space<vmem>>, %arg4: memref<8x24xf32, #tpu.memory_space<vmem>>, %arg5: memref<8x1xf32, #tpu.memory_space<vmem>>, %arg6: memref<8x24xf32, #tpu.memory_space<vmem>>, %arg7: memref<8x1xf32, #tpu.memory_space<vmem>>, %arg8: memref<16x8xf32, #tpu.memory_space<vmem>>, %arg9: memref<1x16x256xf32, #tpu.memory_space<vmem>>) attributes {dimension_semantics = [#tpu.dimension_semantics<parallel>], iteration_bounds = array<i64: 2>, scalar_prefetch = 0 : i64, scratch_operands = 0 : i64, tpu.core_type = #tpu.core_type<tc>, window_params = [{transform_indices = @transform_0, window_bounds = array<i64: 1, 16, 256>}, {pipeline_mode = #tpu.pipeline_mode<synchronous>, transform_indices = @transform_1, window_bounds = array<i64: 1, 256>}, {pipeline_mode = #tpu.pipeline_mode<synchronous>, transform_indices = @transform_2, window_bounds = array<i64: 8, 16>}, {pipeline_mode = #tpu.pipeline_mode<synchronous>, transform_indices = @transform_3, window_bounds = array<i64: 8, 24>}, {pipeline_mode = #tpu.pipeline_mode<synchronous>, transform_indices = @transform_4, window_bounds = array<i64: 8, 1>}, {pipeline_mode = #tpu.pipeline_mode<synchronous>, transform_indices = @transform_5, window_bounds = array<i64: 8, 24>}, {pipeline_mode = #tpu.pipeline_mode<synchronous>, transform_indices = @transform_6, window_bounds = array<i64: 8, 1>}, {pipeline_mode = #tpu.pipeline_mode<synchronous>, transform_indices = @transform_7, window_bounds = array<i64: 16, 8>}, {transform_indices = @transform_8, window_bounds = array<i64: 1, 16, 256>}]} {
    %c0 = arith.constant 0 : index
    %c0_0 = arith.constant 0 : index
    %c0_1 = arith.constant 0 : index
    %0 = vector.load %arg1[%c0, %c0_0, %c0_1] : memref<1x16x256xf32, #tpu.memory_space<vmem>>, vector<1x16x256xf32>
    %1 = vector.shape_cast %0 : vector<1x16x256xf32> to vector<16x256xf32>
    %c0_2 = arith.constant 0 : index
    %c0_3 = arith.constant 0 : index
    %2 = vector.load %arg2[%c0_2, %c0_3] : memref<1x256xi32, #tpu.memory_space<vmem>>, vector<1x256xi32>
    %c0_4 = arith.constant 0 : index
    %c0_5 = arith.constant 0 : index
    %3 = vector.load %arg3[%c0_4, %c0_5] : memref<8x16xf32, #tpu.memory_space<vmem>>, vector<8x16xf32>
    %cst = arith.constant dense<0.000000e+00> : vector<8x256xf32>
    %4 = tpu.matmul %3, %1, %cst {dimension_numbers = #tpu.dot_dimension_numbers<[1], [0], [0], [1], [0, 0, 1, 1], [], []>} : vector<8x16xf32>, vector<16x256xf32>, vector<8x256xf32> -> vector<8x256xf32>
    %cst_6 = arith.constant 0.000000e+00 : f32
    %5 = vector.broadcast %cst_6 : f32 to vector<8x256xf32>
    %6 = arith.maximumf %4, %5 : vector<8x256xf32>
    %cst_7 = arith.constant 0.000000e+00 : f32
    %7 = vector.broadcast %cst_7 : f32 to vector<8x1xf32>
    %8 = vector.extract_strided_slice %6 {offsets = [0, 0], sizes = [8, 255], strides = [1, 1]} : vector<8x256xf32> to vector<8x255xf32>
    %9 = tpu.concatenate %7, %8 in 1 : vector<8x1xf32>, vector<8x255xf32> -> vector<8x256xf32>
    %c1_i32 = arith.constant 1 : i32
    %10 = vector.broadcast %c1_i32 : i32 to vector<1x256xi32>
    %11 = arith.cmpi sge, %2, %10 : vector<1x256xi32>
    %cst_8 = arith.constant 0.000000e+00 : f32
    %12 = vector.broadcast %cst_8 : f32 to vector<8x256xf32>
    %13 = vector.shape_cast %11 : vector<1x256xi1> to vector<1x256xi1>
    %14 = vector.broadcast %13 : vector<1x256xi1> to vector<8x256xi1>
    %15 = arith.select %14, %9, %12 : vector<8x256xi1>, vector<8x256xf32>
    %cst_9 = arith.constant 0.000000e+00 : f32
    %16 = vector.broadcast %cst_9 : f32 to vector<8x1xf32>
    %17 = vector.extract_strided_slice %6 {offsets = [0, 1], sizes = [8, 255], strides = [1, 1]} : vector<8x256xf32> to vector<8x255xf32>
    %18 = tpu.concatenate %17, %16 in 1 : vector<8x255xf32>, vector<8x1xf32> -> vector<8x256xf32>
    %c15_i32 = arith.constant 15 : i32
    %19 = vector.broadcast %c15_i32 : i32 to vector<1x256xi32>
    %20 = arith.cmpi slt, %2, %19 : vector<1x256xi32>
    %cst_10 = arith.constant 0.000000e+00 : f32
    %21 = vector.broadcast %cst_10 : f32 to vector<8x256xf32>
    %22 = vector.shape_cast %20 : vector<1x256xi1> to vector<1x256xi1>
    %23 = vector.broadcast %22 : vector<1x256xi1> to vector<8x256xi1>
    %24 = arith.select %23, %18, %21 : vector<8x256xi1>, vector<8x256xf32>
    %25 = tpu.concatenate %15, %6, %24 in 0 : vector<8x256xf32>, vector<8x256xf32>, vector<8x256xf32> -> vector<24x256xf32>
    %c0_11 = arith.constant 0 : index
    %c0_12 = arith.constant 0 : index
    %26 = vector.load %arg4[%c0_11, %c0_12] : memref<8x24xf32, #tpu.memory_space<vmem>>, vector<8x24xf32>
    %cst_13 = arith.constant dense<0.000000e+00> : vector<8x256xf32>
    %27 = tpu.matmul %26, %25, %cst_13 {dimension_numbers = #tpu.dot_dimension_numbers<[1], [0], [0], [1], [0, 0, 1, 1], [], []>} : vector<8x24xf32>, vector<24x256xf32>, vector<8x256xf32> -> vector<8x256xf32>
    %c0_14 = arith.constant 0 : index
    %c0_15 = arith.constant 0 : index
    %28 = vector.load %arg5[%c0_14, %c0_15] : memref<8x1xf32, #tpu.memory_space<vmem>>, vector<8x1xf32>
    %29 = vector.broadcast %28 : vector<8x1xf32> to vector<8x256xf32>
    %30 = arith.addf %27, %29 : vector<8x256xf32>
    %cst_16 = arith.constant 0.000000e+00 : f32
    %31 = vector.broadcast %cst_16 : f32 to vector<8x256xf32>
    %32 = arith.maximumf %30, %31 : vector<8x256xf32>
    %cst_17 = arith.constant 0.000000e+00 : f32
    %33 = vector.broadcast %cst_17 : f32 to vector<8x16xf32>
    %34 = vector.extract_strided_slice %32 {offsets = [0, 0], sizes = [8, 240], strides = [1, 1]} : vector<8x256xf32> to vector<8x240xf32>
    %35 = tpu.concatenate %33, %34 in 1 : vector<8x16xf32>, vector<8x240xf32> -> vector<8x256xf32>
    %cst_18 = arith.constant 0.000000e+00 : f32
    %36 = vector.broadcast %cst_18 : f32 to vector<8x16xf32>
    %37 = vector.extract_strided_slice %32 {offsets = [0, 16], sizes = [8, 240], strides = [1, 1]} : vector<8x256xf32> to vector<8x240xf32>
    %38 = tpu.concatenate %37, %36 in 1 : vector<8x240xf32>, vector<8x16xf32> -> vector<8x256xf32>
    %39 = tpu.concatenate %35, %32, %38 in 0 : vector<8x256xf32>, vector<8x256xf32>, vector<8x256xf32> -> vector<24x256xf32>
    %c0_19 = arith.constant 0 : index
    %c0_20 = arith.constant 0 : index
    %40 = vector.load %arg6[%c0_19, %c0_20] : memref<8x24xf32, #tpu.memory_space<vmem>>, vector<8x24xf32>
    %cst_21 = arith.constant dense<0.000000e+00> : vector<8x256xf32>
    %41 = tpu.matmul %40, %39, %cst_21 {dimension_numbers = #tpu.dot_dimension_numbers<[1], [0], [0], [1], [0, 0, 1, 1], [], []>} : vector<8x24xf32>, vector<24x256xf32>, vector<8x256xf32> -> vector<8x256xf32>
    %c0_22 = arith.constant 0 : index
    %c0_23 = arith.constant 0 : index
    %42 = vector.load %arg7[%c0_22, %c0_23] : memref<8x1xf32, #tpu.memory_space<vmem>>, vector<8x1xf32>
    %43 = vector.broadcast %42 : vector<8x1xf32> to vector<8x256xf32>
    %44 = arith.addf %41, %43 : vector<8x256xf32>
    %cst_24 = arith.constant 0.000000e+00 : f32
    %45 = vector.broadcast %cst_24 : f32 to vector<8x256xf32>
    %46 = arith.maximumf %44, %45 : vector<8x256xf32>
    %c0_25 = arith.constant 0 : index
    %c0_26 = arith.constant 0 : index
    %47 = vector.load %arg8[%c0_25, %c0_26] : memref<16x8xf32, #tpu.memory_space<vmem>>, vector<16x8xf32>
    %cst_27 = arith.constant dense<0.000000e+00> : vector<16x256xf32>
    %48 = tpu.matmul %47, %46, %cst_27 {dimension_numbers = #tpu.dot_dimension_numbers<[1], [0], [0], [1], [0, 0, 1, 1], [], []>} : vector<16x8xf32>, vector<8x256xf32>, vector<16x256xf32> -> vector<16x256xf32>
    %49 = arith.addf %48, %1 : vector<16x256xf32>
    %cst_28 = arith.constant 0.000000e+00 : f32
    %50 = vector.broadcast %cst_28 : f32 to vector<16x256xf32>
    %51 = arith.maximumf %49, %50 : vector<16x256xf32>
    %c0_29 = arith.constant 0 : index
    %c0_30 = arith.constant 0 : index
    %c0_31 = arith.constant 0 : index
    %52 = vector.load %arg9[%c0_29, %c0_30, %c0_31] : memref<1x16x256xf32, #tpu.memory_space<vmem>>, vector<1x16x256xf32>
    %53 = vector.shape_cast %52 : vector<1x16x256xf32> to vector<16x256xf32>
    %54 = vector.shape_cast %51 : vector<16x256xf32> to vector<1x16x256xf32>
    tpu.vector_store %arg9[%c0_29, %c0_30, %c0_31], %54 {strides = array<i32>} : memref<1x16x256xf32, #tpu.memory_space<vmem>>, vector<1x16x256xf32>,
    return
  }
  func.func @transform_0(%arg0: i32) -> (i32, i32, i32) {
    %c0_i32 = arith.constant 0 : i32
    %c0_i32_0 = arith.constant 0 : i32
    %c0_i32_1 = arith.constant 0 : i32
    return %arg0, %c0_i32, %c0_i32_0 : i32, i32, i32
  }
  func.func @transform_1(%arg0: i32) -> (i32, i32) {
    %c0_i32 = arith.constant 0 : i32
    %c0_i32_0 = arith.constant 0 : i32
    %c0_i32_1 = arith.constant 0 : i32
    return %c0_i32, %c0_i32_0 : i32, i32
  }
  func.func @transform_2(%arg0: i32) -> (i32, i32) {
    %c0_i32 = arith.constant 0 : i32
    %c0_i32_0 = arith.constant 0 : i32
    %c0_i32_1 = arith.constant 0 : i32
    return %c0_i32, %c0_i32_0 : i32, i32
  }
  func.func @transform_3(%arg0: i32) -> (i32, i32) {
    %c0_i32 = arith.constant 0 : i32
    %c0_i32_0 = arith.constant 0 : i32
    %c0_i32_1 = arith.constant 0 : i32
    return %c0_i32, %c0_i32_0 : i32, i32
  }
  func.func @transform_4(%arg0: i32) -> (i32, i32) {
    %c0_i32 = arith.constant 0 : i32
    %c0_i32_0 = arith.constant 0 : i32
    %c0_i32_1 = arith.constant 0 : i32
    return %c0_i32, %c0_i32_0 : i32, i32
  }
  func.func @transform_5(%arg0: i32) -> (i32, i32) {
    %c0_i32 = arith.constant 0 : i32
    %c0_i32_0 = arith.constant 0 : i32
    %c0_i32_1 = arith.constant 0 : i32
    return %c0_i32, %c0_i32_0 : i32, i32
  }
  func.func @transform_6(%arg0: i32) -> (i32, i32) {
    %c0_i32 = arith.constant 0 : i32
    %c0_i32_0 = arith.constant 0 : i32
    %c0_i32_1 = arith.constant 0 : i32
    return %c0_i32, %c0_i32_0 : i32, i32
  }
  func.func @transform_7(%arg0: i32) -> (i32, i32) {
    %c0_i32 = arith.constant 0 : i32
    %c0_i32_0 = arith.constant 0 : i32
    %c0_i32_1 = arith.constant 0 : i32
    return %c0_i32, %c0_i32_0 : i32, i32
  }
  func.func @transform_8(%arg0: i32) -> (i32, i32, i32) {
    %c0_i32 = arith.constant 0 : i32
    %c0_i32_0 = arith.constant 0 : i32
    %c0_i32_1 = arith.constant 0 : i32
    return %arg0, %c0_i32, %c0_i32_0 : i32, i32, i32
  }
}

</mosaic_0001>

<bundles_post_ra>
// kernel: tpu_custom_call.1
= control target key start
LH: loop header
LB: loop body
LE: loop exit
PB: predicated region body
PF: predicated region fallthrough
CT: control target
= control target key end

     0   :  { %13 = vsyncpa [#allocation3], 0  ;;  %s1309_s0 = inlined_call_operand.hbm [shape: f32[2,16,256], index: 0, kind: input, shape index: {}]   ;;  %s1310_s1 = inlined_call_operand.vmem [shape: s32[1,256], index: 1, kind: input, shape index: {}]   ;;  %s1311_s2 = inlined_call_operand.vmem [shape: f32[8,16], index: 2, kind: input, shape index: {}]   ;;  %s1312_s3 = inlined_call_operand.vmem [shape: f32[8,24], index: 3, kind: input, shape index: {}]   ;;  %s1313_s4 = inlined_call_operand.vmem [shape: f32[8,1], index: 4, kind: input, shape index: {}]   ;;  %s1314_s5 = inlined_call_operand.vmem [shape: f32[8,24], index: 5, kind: input, shape index: {}]   ;;  %s1315_s6 = inlined_call_operand.vmem [shape: f32[8,1], index: 6, kind: input, shape index: {}]   ;;  %s1316_s7 = inlined_call_operand.vmem [shape: f32[16,8], index: 7, kind: input, shape index: {}]   ;;  %s1317_s8 = inlined_call_operand.hbm [shape: f32[2,16,256], index: 8, kind: output, shape index: {}]  }
   0x1   :  { %15 = vsyncpa [#allocation3 + $0x1], 0 }
   0x2   :  { %16 = vsyncpa [#allocation4], 0 }
   0x3   :  { %18 = vsyncpa [#allocation4 + $0x1], 0  ;;  %s1088_s27 = smov 0   ;;  %s1090_s28 = smov 0  }
   0x4   :  { %s1092_s29 = smov 0   ;;  %s1094_s30 = smov 0  }
   0x5 LB: > { %s1109_s9 = sadd.s32 4294967295, %s1029_s30   ;;  %s822_s10 = sadd.s32 4294967294, %s1029_s30   ;;  %s1029_s30 = sphi %s1094_s30, %s1330_s30   ;;  %s1025_s29 = sphi %s1092_s29, %s1329_s29   ;;  %s1021_s28 = sphi %s1090_s28, %s1328_s28   ;;  %s1017_s27 = sphi %s1088_s27, %s1327_s27  }
   0x6   : > { %s1113_s11 = sadd.s32 1, %s1029_s30   ;;  %s31_s12 = sadd.s32 1, %s1025_s29 }
   0x7   : > { %s28_s13 = ssub.s32 %s1029_s30, %s1113_s11  ;;  %p38_p0 = scmp.ne.s32.totalorder %s1025_s29, %s1021_s28 }
   0x8   : > { %p29_p1 = scmp.eq.s32.totalorder %s28_s13, 0  ;;  %p39_p2 = scmp.eq.s32.totalorder %s1029_s30, 0 }
   0x9   : > { %p44_p3 = scmp.ne.s32.totalorder %s1021_s28, %s1017_s27  ;;  %p45_p4 = scmp.eq.s32.totalorder %s1109_s9, 0 }
   0xa   : > { %s1125_s14 = scalar_select %p29_p1, %s1025_s29, %s31_s12  }
   0xb   : > { %p1127_p5 = por %p39_p2, %p38_p0  ;;  %p1131_p6 = por %p45_p4, %p44_p3 }
   0xc   : > { %p215_p7 = scmp.eq.s32.totalorder %s1109_s9, 1  ;;  %p221_p8 = scmp.eq.s32.totalorder %s822_s10, 1 }
   0xd   : > { %p877_p10 = scmp.lt.s32.totalorder %s1029_s30, 2  ;;  %s262_s19 = sand.u32 1, %s1025_s29  }
   0xe   : > { %p1138_p11 = por %p215_p7, %p38_p0  ;;  %p1142_p12 = por %p221_p8, %p44_p3 }
   0xf   : > { %s848_s20 = sshll.u32 %s1029_s30, 9  ;;  %s825_s21 = sshll.u32 %s262_s19, 5 }
  0x10   : > { %s1321_s17 = scalar_select %p1138_p11, 1, 0 }
  0x11   : > { %s1322_s18 = scalar_select %p1142_p12, 1, 0 }
  0x12   : > { %s1151_s24 = scalar_lea.hbm %s1309_s0, %s848_s20  ;;  %s266_s25 = scalar_lea.vmem [#allocation2], %s825_s21 }
  0x13   : > { %s273_s26 = sshll.u32 %s266_s25, 4  ;;  %p1155_p13 = pnand %p877_p10, %p1127_p5  ;;  %s1159_s26 = int_to_ptr.vmem [resolvable:$true] %s273_s26 }
  0x14   : > { %s1161_s12 = scalar_lea.sflag [#allocation3], %s262_s19  ;;  %s933_s13 = scalar_lea.hbm %s1151_s24, 512 }
  0x15   : > { %p934_p0 = scmp.ne.s32.totalorder %s1151_s24, %s933_s13  ;;  %p935_p1 = pneg %p1155_p13 }
  0x16   : > { %s938_s21 = scalar_lea.hbm %s1309_s0, 1024  ;;  %p939_p4 = scmp.lt.u32.totalorder %s1151_s24, %s1309_s0 }
  0x17   : > { %p936_p2 = pnand %p935_p1, %p934_p0  ;;  %p940_p5 = scmp.lt.u32.totalorder %s938_s21, %s933_s13 }
  0x18   : > { %p942_p8 = scmp.lt.u32.totalorder %s933_s13, %s1151_s24 }
  0x19   : > { %p937_p3 = pneg %p936_p2  ;;  %p941_p7 = por %p940_p5, %p939_p4 }
  0x1b   : > { %p943_p10 = por %p942_p8, %p941_p7 }
  0x1d   : > { %p944_p9 = pnand %p943_p10, %p937_p3 }
  0x1f   : > { %947 = shalt.err (!%p944_p9)
}
  0x20   : > { %s948_s19 = scalar_lea.vmem %s1159_s26, 512  ;;  %s1031_s25 = smov [#allocation2]  }
  0x21   : > { %p949_p0 = scmp.ne.s32.totalorder %s1159_s26, %s948_s19  ;;  %s953_s20 = sshll.u32 %s1031_s25, 4  ;;  %s954_s20 = int_to_ptr.vmem [resolvable:$false] %s953_s20 }
  0x22   : > { %s955_s15 = scalar_lea.vmem %s954_s20, 1024  ;;  %p956_p11 = scmp.lt.s32.totalorder %s1159_s26, %s954_s20 }
  0x23   : > { %p951_p2 = pnand %p949_p0, %p935_p1  ;;  %p957_p4 = scmp.lt.s32.totalorder %s955_s15, %s948_s19 }
  0x25   : > { %p952_p12 = pneg %p951_p2  ;;  %p958_p5 = por %p957_p4, %p956_p11 }
  0x27   : > { %p959_p7 = pnand %p958_p5, %p952_p12 }
  0x29   : > { %962 = shalt.err (!%p959_p7)
}
  0x2a   : > { %s1032_s13 = smov 256   ;;  %s1033_s21 = smov 16  }
  0x2b   : > { %872 = dma.hbm_to_vmem [thread:$0]  (!%p1155_p13), %s1151_s24, 512, %s1159_s26, %s1161_s12, %s1032_s13, %s1032_s13, %s1033_s21  }
  0x2c   : > { %p828_p9 = scmp.ge.s32.totalorder %s1029_s30, 1  ;;  %p281_p1 = scmp.lt.s32.totalorder %s1029_s30, 3 }
  0x2e   : > { %p282_p3 = pnand %p828_p9, %p281_p1 }
  0x2f   : > { %s1192_s22 = sand.u32 (!%p282_p3), 1, %s1021_s28  }
  0x30   : > { %285 = sbr.rel (%p282_p3) target bundleno = 1206 (0x4b6), region = 52  ;;  %s829_s23 = sshll.u32 (!%p282_p3), %s1192_s22, 5 }
  0x31   : > { %s288_s19 = scalar_lea.sflag (!%p282_p3), [#allocation3], %s1192_s22  ;;  %s291_s25 = scalar_lea.vmem (!%p282_p3), [#allocation2], %s829_s23 }
  0x37   : > { %1008 = dma.done.wait (%p1131_p6), %s288_s19, 512  }
  0x38   : > { %1010 = vsyncadd (%p1131_p6), %s288_s19, 4294966784  ;;  %v1034_v0 = vmov 0.0   ;;  %v1204_v1 = vld [vmem:[%s291_s25 + $0x8] sm:$0xff]  ;;  %v1206_v2 = vld [vmem:[%s291_s25 + $0x18] sm:$0xff]  ;;  %vm330_vm0 = vcmask 130048   ;;  %v1035_v8 = vmov 0   ;;  %v420_v15 = vlaneseq }
  0x39   : > { %398 = vmatprep.mubr.f32.mxu0 %v1034_v0  ;;  %530 = vmatprep.mubr.f32.mxu1 %v1034_v0  ;;  %v1208_v3 = vld [vmem:[%s291_s25] sm:$0xff]  ;;  %v850_v4 = vpack.c.bf16 %v1206_v2, %v1204_v1  ;;  %v1212_v5 = vld [vmem:[%s291_s25 + $0x10] sm:$0xff]  ;;  %s1036_s26 = smov 127   ;;  %s1037_s20 = smov 1   ;;  %vm413_vm3 = vcmask 7168   ;;  %vm1038_vm6 = vmmov 1   ;;  %vm837_vm13 = vmneg %vm330_vm0 }
  0x3a   : > { %v852_v6 = vpack.c.bf16 %v1212_v5, %v1208_v3  ;;  %v329_v7 = vld [vmem:[%s1311_s2] sm:$0xff]  ;;  %926 = vset.pattern.permute.xlu1 %v1035_v8  ;;  %932 = vset.pattern.permute.xlu0 %v1035_v8  ;;  %v421_v17 = vshrl.u32 %v420_v15, 7  ;;  %vm436_vm8 = vcmask 1039360   ;;  %vm462_vm12 = vcmask 195584   ;;  %s1039_s25 = smov 112   ;;  %vm863_vm14 = vmpackc.low %vm1038_vm6, %vm837_vm13  ;;  %s323_s19 = scalar_lea.vmem [#allocation5], %s829_s23 }
  0x3b   : > { %851 = vmatprep.subr.bf16.mxu0 %v850_v4  ;;  %v456_v14 = vld [vmem:[%s1313_s4] sm:$0xff]  ;;  %vm553_vm15 = vcmask 916480   ;;  %s849_s16 = sshll.u32 %s1109_s9, 9  ;;  %s736_s12 = scalar_lea.sflag [#allocation4], %s1192_s22 }
  0x3c   : > { %853 = vmatpush1.bf16.msra.mxu0 %v852_v6  ;;  %v328_v16 = vld [vmem:[%s1310_s1] sm:$0x3]  ;;  %v426_v18 = vsub.s32 1, %v421_v17  ;;  %v422_v20 = vsub.s32 0, %v421_v17  ;;  %v642_v6 = vld [vmem:[%s1316_s7 + $0x8] sm:$0xff]  ;;  %s1264_s10 = scalar_lea.hbm %s1317_s8, %s849_s16  ;;  %p1324_p11 = scmp.ne.s32.totalorder %s1321_s17, 0 }
  0x3d   : > { %vm418_vm1 = vcmp.ge.s32.totalorder %v328_v16, 1  ;;  %vm441_vm2 = vcmp.lt.s32.totalorder %v328_v16, 15  ;;  %v455_v36 = vld [vmem:[%s1312_s3] sm:$0xff]  ;;  %s1041_s9 = smov [#allocation5]  }
  0x3e   : > { %v419_v19 = vsel %vm418_vm1, 1, %v1035_v8  ;;  %v442_v23 = vsel %vm441_vm2, 1, %v1035_v8  ;;  %v559_v46 = vld [vmem:[%s1315_s6] sm:$0xff]  ;;  %s967_s15 = sshll.u32 %s1041_s9, 4  ;;  %s968_s15 = int_to_ptr.vmem [resolvable:$false] %s967_s15 }
  0x3f   : > { %831 = vmatmul.mubr.msk.f32.vlgmr.msra.gmra.mrb[0].mxu0 %vm330_vm0, %v329_v7  ;;  %v427_v21 = vrot.slane %v419_v19, %v426_v18  ;;  %v423_v22 = vrot.slane %v419_v19, %v422_v20  ;;  %v450_v27 = vrot.slane %v442_v23, %v426_v18  ;;  %v446_v33 = vrot.slane %v442_v23, %v422_v20  ;;  %v558_v55 = vld [vmem:[%s1314_s5] sm:$0xff]  ;;  %s969_s13 = scalar_lea.vmem %s968_s15, 1024 }
  0x40   : > { %632 = vmatprep.mubr.f32.mxu0 %v1034_v0  ;;  %v641_v4 = vld [vmem:[%s1316_s7] sm:$0xff] }
  0x41   : > { %vm429_vm4 = vcmp.eq.s32.totalorder %v427_v21, 1  ;;  %vm428_vm5 = vcmp.eq.s32.totalorder %v423_v22, 1  ;;  %vm452_vm10 = vcmp.eq.s32.totalorder %v450_v27, 1  ;;  %vm451_vm11 = vcmp.eq.s32.totalorder %v446_v33, 1 }
  0x42   : > { %vm855_vm7 = vmpackc.low %vm1038_vm6, %vm429_vm4 }
  0x43   : > { %vm858_vm9 = vmpackc.low %vm1038_vm6, %vm428_vm5 }
 0x112   : > { %v400_v9 = vpop.f32.mrb[0].mxu0 }
 0x113   : > { %v405_v10 = vmax.f32 %v400_v9, 0.0  ;;  %v402_v11 = vpop.f32.mrb[1].mxu0 }
 0x114   : > { %v406_v12 = vmax.f32 %v402_v11, 0.0 }
 0x115   : > { %432 = vrot.lane.b32.xlu1 %v405_v10, %s1036_s26 }
 0x116   : > { %v921_v13 = vpack.i.bf16 %v406_v12, %v405_v10 }
 0x118   : > { %922 = vrot.lane.b32.xlu0 %v921_v13, %s1037_s20 }
 0x119   : > { %459 = vperm.xlu1 %926, %v456_v14  }
 0x11c   : > { %434 = vrot.lane.b32.xlu0 %v406_v12, %s1036_s26  ;;  %s1040_s26 = smov 16  }
 0x187   : > { %v433_v35 = vpop.permute.xlu1 %432 }
 0x18a   : > { %v923_v24 = vpop.permute.xlu0 %922 }
 0x18b   : > { %v925_v25 = vunpack.i.h.bf16 %v923_v24  ;;  %v924_v26 = vunpack.i.l.bf16 %v923_v24 }
 0x18d   : > { %v417_v28 = vsel %vm413_vm3, 0.0, %v924_v26  ;;  %v414_v29 = vsel %vm413_vm3, %v924_v26, %v925_v25 }
 0x18e   : > { %v435_v30 = vpop.permute.xlu0 %434  ;;  %v854_v31 = vpack.c.bf16 %v406_v12, %v414_v29  ;;  %v857_v32 = vpack.c.bf16 %v405_v10, %v417_v28 }
 0x18f   : > { %v440_v34 = vsel %vm436_vm8, %v435_v30, 0.0  ;;  %v437_v37 = vsel %vm436_vm8, %v433_v35, %v435_v30 }
 0x190   : > { %856 = vmatprep.subr.msk.bf16.mxu1 %vm855_vm7, %v854_v31 }
 0x191   : > { %859 = vmatpush1.bf16.msk.msra.mxu1 %vm858_vm9, %v857_v32 }
 0x192   : > { %834 = vmatprep.subr.msk.mxu1 %vm452_vm10, %v440_v34 }
 0x195   : > { %835 = vmatpush1.msk.msra.mxu1 %vm451_vm11, %v437_v37 }
 0x196   : > { %836 = vmatmul.mubr.msk.f32.vlgmr.msra.gmra.mrb[0].mxu1 %vm462_vm12, %v455_v36 }
 0x197   : > { %714 = vmatprep.mubr.f32.mxu1 %v1034_v0 }
 0x198   : > { %v460_v38 = vpop.permute.xlu1 %459 }
 0x269   : > { %v532_v39 = vpop.f32.mrb[0].mxu1 }
 0x26a   : > { %v533_v40 = vadd.f32 %v532_v39, %v460_v38  ;;  %v534_v41 = vpop.f32.mrb[1].mxu1 }
 0x26b   : > { %v535_v42 = vadd.f32 %v534_v41, %v460_v38 }
 0x26c   : > { %v537_v43 = vmax.f32 %v533_v40, 0.0 }
 0x26d   : > { %v538_v44 = vmax.f32 %v535_v42, 0.0 }
 0x26e   : > { %549 = vrot.lane.b32.xlu1 %v537_v43, %s1039_s25 }
 0x26f   : > { %v927_v45 = vpack.i.bf16 %v538_v44, %v537_v43 }
 0x271   : > { %928 = vrot.lane.b32.xlu0 %v927_v45, %s1040_s26 }
 0x272   : > { %562 = vperm.xlu1 %926, %v559_v46  }
 0x275   : > { %551 = vrot.lane.b32.xlu0 %v538_v44, %s1039_s25  ;;  %s749_s25 = sshll.u32 %s323_s19, 4  ;;  %s1259_s25 = int_to_ptr.vmem [resolvable:$true] %s749_s25 }
 0x276   : > { %s963_s20 = scalar_lea.vmem %s1259_s25, 512  ;;  %p970_p8 = scmp.lt.s32.totalorder %s1259_s25, %s968_s15 }
 0x277   : > { %p964_p6 = scmp.ne.s32.totalorder %s1259_s25, %s963_s20  ;;  %p971_p10 = scmp.lt.s32.totalorder %s969_s13, %s963_s20 }
 0x279   : > { %p965_p12 = pnand %p964_p6, %p1324_p11  ;;  %p972_p0 = por %p971_p10, %p970_p8 }
 0x27b   : > { %p966_p13 = pneg %p965_p12 }
 0x27d   : > { %p973_p2 = pnand %p972_p0, %p966_p13 }
 0x2e0   : > { %v550_v54 = vpop.permute.xlu1 %549 }
 0x2e3   : > { %v929_v47 = vpop.permute.xlu0 %928 }
 0x2e4   : > { %v931_v48 = vunpack.i.h.bf16 %v929_v47  ;;  %v930_v49 = vunpack.i.l.bf16 %v929_v47 }
 0x2e6   : > { %v545_v50 = vsel %vm330_vm0, %v930_v49, %v931_v48  ;;  %v862_v52 = vpack.c.bf16 %v537_v43, %v930_v49  ;;  %vm643_vm0 = vcmask 64512  }
 0x2e7   : > { %v860_v51 = vpack.c.bf16 %v538_v44, %v545_v50  ;;  %v552_v53 = vpop.permute.xlu0 %551 }
 0x2e8   : > { %v554_v56 = vsel %vm553_vm15, %v550_v54, %v552_v53 }
 0x2e9   : > { %861 = vmatprep.subr.bf16.mxu0 %v860_v51 }
 0x2ea   : > { %864 = vmatpush1.bf16.msk.msra.mxu0 %vm863_vm14, %v862_v52 }
 0x2eb   : > { %839 = vmatprep.subr.msk.mxu0 %vm553_vm15, %v552_v53 }
 0x2ee   : > { %573 = vmatpush1.msra.mxu0 %v554_v56 }
 0x2ef   : > { %840 = vmatmul.mubr.msk.f32.vlgmr.msra.gmra.mrb[2].mxu0 %vm462_vm12, %v558_v55 }
 0x2f1   : > { %v563_v57 = vpop.permute.xlu1 %562 }
 0x3c2   : > { %v634_v58 = vpop.f32.mrb[2].mxu0 }
 0x3c3   : > { %v635_v59 = vadd.f32 %v634_v58, %v563_v57  ;;  %v636_v60 = vpop.f32.mrb[3].mxu0 }
 0x3c4   : > { %v637_v61 = vadd.f32 %v636_v60, %v563_v57 }
 0x3c5   : > { %v639_v63 = vmax.f32 %v635_v59, 0.0 }
 0x3c6   : > { %v640_v62 = vmax.f32 %v637_v61, 0.0 }
 0x3c8   : > { %650 = vmatprep.subr.mxu1 %v640_v62 }
 0x3c9   : > { %651 = vmatpush1.msra.mxu1 %v639_v63 }
 0x3ca   : > { %841 = vmatmul.mubr.msk.f32.vlgmr.msra.gmra.mrb[2].mxu1 %vm643_vm0, %v641_v4 }
 0x3cb   : > { %720 = vmatprep.mubr.f32.mxu1 %v1034_v0 }
 0x3ce   : > { %842 = vmatmul.mubr.msk.f32.gmra.mrb[4].mxu1 %vm643_vm0, %v642_v6 }
 0x49d   : > { %v716_v7 = vpop.f32.mrb[2].mxu1 }
 0x49e   : > { %v717_v8 = vadd.f32 %v716_v7, %v1208_v3  ;;  %v718_v9 = vpop.f32.mrb[3].mxu1 }
 0x49f   : > { %v719_v10 = vadd.f32 %v718_v9, %v1204_v1 }
 0x4a0   : > { %v727_v11 = vmax.f32 %v717_v8, 0.0 }
 0x4a1   : > { %v728_v12 = vmax.f32 %v719_v10, 0.0  ;;  %v722_v13 = vpop.f32.mrb[4].mxu1 }
 0x4a2   : > { %731 = vst [vmem:[%s323_s19] sm:$0xff] %v727_v11  ;;  %v723_v0 = vadd.f32 %v722_v13, %v1212_v5  ;;  %v724_v14 = vpop.f32.mrb[5].mxu1 }
 0x4a3   : > { %732 = vst [vmem:[%s323_s19 + $0x8] sm:$0xff] %v728_v12  ;;  %v725_v15 = vadd.f32 %v724_v14, %v1206_v2 }
 0x4a4   : > { %v729_v1 = vmax.f32 %v723_v0, 0.0 }
 0x4a5   : > { %v730_v3 = vmax.f32 %v725_v15, 0.0 }
 0x4a6   : > { %733 = vst [vmem:[%s323_s19 + $0x10] sm:$0xff] %v729_v1 }
 0x4a7   : > { %734 = vst [vmem:[%s323_s19 + $0x18] sm:$0xff] %v730_v3 }
 0x4a8   : > { %976 = shalt.err (!%p973_p2)
}
 0x4a9   : > { %s977_s21 = scalar_lea.hbm %s1264_s10, 512  ;;  %s981_s23 = scalar_lea.hbm %s1317_s8, 1024 }
 0x4aa   : > { %p978_p4 = scmp.ne.s32.totalorder %s1264_s10, %s977_s21  ;;  %p982_p9 = scmp.lt.u32.totalorder %s1264_s10, %s1317_s8 }
 0x4ab   : > { %p983_p1 = scmp.lt.u32.totalorder %s981_s23, %s977_s21  ;;  %p985_p6 = scmp.lt.u32.totalorder %s977_s21, %s1264_s10 }
 0x4ac   : > { %p979_p5 = pnand %p978_p4, %p1324_p11 }
 0x4ad   : > { %p984_p3 = por %p983_p1, %p982_p9 }
 0x4ae   : > { %p980_p7 = pneg %p979_p5 }
 0x4af   : > { %p986_p12 = por %p985_p6, %p984_p3 }
 0x4b1   : > { %p987_p13 = pnand %p986_p12, %p980_p7 }
 0x4b3   : > { %990 = shalt.err (!%p987_p13)
}
 0x4b4   : > { %s1042_s20 = smov 256  }
 0x4b5   : > { %867 = dma.vmem_to_hbm [thread:$0]  (%p1324_p11), %s1259_s25, 512, %s1264_s10, %s736_s12, %s1042_s20, %s1042_s20, %s1040_s26  }
 0x4b6 PF: > { %s764_s15 = sand.u32 1, %s1017_s27   ;;  %p1325_p8 = scmp.ne.s32.totalorder %s1322_s18, 0 }
 0x4b7   : > { %p1326_p10 = scmp.ge.s32.totalorder %s1029_s30, 2  ;;  %s765_s13 = scalar_lea.sflag [#allocation4], %s764_s15 }
 0x4b9   : > { %p874_p0 = pnand %p1326_p10, %p1325_p8 }
 0x4bb   : > { %1012 = dma.done.wait (!%p874_p0), %s765_s13, 512  }
 0x4bc   : > { %1014 = vsyncadd (!%p874_p0), %s765_s13, 4294966784  ;;  %p21_p2 = scmp.ge.s32.totalorder %s1113_s11, 4   ;;  %s1327_s27 = smov %s1021_s28 }
 0x4bd   : > { %s1328_s28 = smov %s1025_s29  ;;  %s1329_s29 = smov %s1125_s14 }
 0x4be   : > { %s1330_s30 = smov %s1113_s11  ;;  %23 = sbr.rel (!%p21_p2) target bundleno = 5 (0x5), region = 97 }
 0x4c5   :  { %770 = vsyncpa [#allocation3], 1 }
 0x4c6   :  { %772 = vsyncpa [#allocation3 + $0x1], 1 }
 0x4c7   :  { %773 = vsyncpa [#allocation4], 1 }
 0x4c8   :  { %775 = vsyncpa [#allocation4 + $0x1], 1 }

</bundles_post_ra>
